<compile_context>
chip_gen: v7x
topology: tpu7x:2x2x1
jax: 0.10.0
libtpu: 0.0.40
codegen_flags: <defaults>
</compile_context>

<pallas_src>
import jax
import jax.numpy as jnp
from jax.experimental import pallas as pl
from jax.experimental.pallas import tpu as pltpu


def mlp_kernel(x_ref, w1_ref, b1_ref, w2_ref, b2_ref, o_ref):
    # x: [tb, F], w1: [F, H] (pre-transposed), b1: [1, H]
    # w2: [H, O_pad] (pre-transposed, zero-padded), b2: [1, O_pad]
    h = jnp.dot(x_ref[...], w1_ref[...], preferred_element_type=jnp.float32)
    h = jnp.maximum(h + b1_ref[...], 0.0)                 # bias + ReLU on VPU
    y = jnp.dot(h, w2_ref[...], preferred_element_type=jnp.float32)
    o_ref[...] = (y + b2_ref[...]).astype(o_ref.dtype)    # lane-dense store


def _round_up(n, m):
    return -(-n // m) * m


def mynet_forward(x, w1, b1, w2, b2, *, block_b=256):
    """Pallas forward of MyNet; w1/w2 in PyTorch [out, in] layout."""
    B, F = x.shape
    H = w1.shape[0]
    O = w2.shape[0]

    # ---- wrapper-side (amortized under jit) layout prep -------------------
    w1_t = w1.T                                            # [F, H]
    O_pad = _round_up(max(O, 128), 128)                    # lane-dense output
    w2_t = jnp.zeros((H, O_pad), w2.dtype).at[:, :O].set(w2.T)   # [H, O_pad]
    b1_2d = b1.reshape(1, H)
    b2_2d = jnp.zeros((1, O_pad), b2.dtype).at[0, :O].set(b2)

    # batch tiling: multiples of 8 (f32 sublane), cap tile so a scaled-up run
    # stays well inside v7x's VMEM budget.
    tb = min(block_b, _round_up(max(B, 8), 8))
    B_pad = _round_up(B, tb)
    if B_pad != B:
        x = jnp.zeros((B_pad, F), x.dtype).at[:B].set(x)

    out = pl.pallas_call(
        mlp_kernel,
        out_shape=jax.ShapeDtypeStruct((B_pad, O_pad), x.dtype),
        grid=(B_pad // tb,),
        in_specs=[
            pl.BlockSpec((tb, F), lambda i: (i, 0)),       # x tile per step
            pl.BlockSpec((F, H), lambda i: (0, 0)),        # W1^T resident
            pl.BlockSpec((1, H), lambda i: (0, 0)),        # b1 resident
            pl.BlockSpec((H, O_pad), lambda i: (0, 0)),    # W2^T resident
            pl.BlockSpec((1, O_pad), lambda i: (0, 0)),    # b2 resident
        ],
        out_specs=pl.BlockSpec((tb, O_pad), lambda i: (i, 0)),
        compiler_params=pltpu.CompilerParams(
            dimension_semantics=("parallel",),             # megacore-shardable
        ),
    )(x, w1_t, b1_2d, w2_t, b2_2d)

    return out[:B, :O]


if __name__ == "__main__":
    # MyNet(n_feature=16, n_hidden=32, n_output=4), batch=8
    B, F, H, O = 8, 16, 32, 4
    key = jax.random.PRNGKey(0)
    kx, kw1, kb1, kw2, kb2 = jax.random.split(key, 5)

    x = jax.random.normal(kx, (B, F), dtype=jnp.float32)
    # deterministic init mimicking nn.Linear's uniform(-1/sqrt(fan_in), ...)
    w1 = jax.random.uniform(kw1, (H, F), jnp.float32, -1.0 / F ** 0.5, 1.0 / F ** 0.5)
    b1 = jax.random.uniform(kb1, (H,), jnp.float32, -1.0 / F ** 0.5, 1.0 / F ** 0.5)
    w2 = jax.random.uniform(kw2, (O, H), jnp.float32, -1.0 / H ** 0.5, 1.0 / H ** 0.5)
    b2 = jax.random.uniform(kb2, (O,), jnp.float32, -1.0 / H ** 0.5, 1.0 / H ** 0.5)

    y = mynet_forward(x, w1, b1, w2, b2)
    jax.block_until_ready(y)

    # reference check in plain JAX (matches nn.Linear semantics)
    y_ref = jnp.maximum(x @ w1.T + b1, 0.0) @ w2.T + b2
    assert y.shape == y_ref.shape, "shape mismatch vs reference"
    assert jnp.allclose(y, y_ref, atol=1e-5, rtol=1e-5), "mismatch vs reference"

    print("KERNEL_OK")
</pallas_src>

<mosaic_0001>
module attributes {stable_mosaic.version = 11 : i64} {
  func.func @mlp_kernel(%arg0: i32, %arg1: memref<8x16xf32, #tpu.memory_space<vmem>>, %arg2: memref<16x32xf32, #tpu.memory_space<vmem>>, %arg3: memref<1x32xf32, #tpu.memory_space<vmem>>, %arg4: memref<32x128xf32, #tpu.memory_space<vmem>>, %arg5: memref<1x128xf32, #tpu.memory_space<vmem>>, %arg6: memref<8x128xf32, #tpu.memory_space<vmem>>) attributes {dimension_semantics = [#tpu.dimension_semantics<parallel>], iteration_bounds = array<i64: 1>, scalar_prefetch = 0 : i64, scratch_operands = 0 : i64, tpu.core_type = #tpu.core_type<tc>, window_params = [{transform_indices = @transform_0, window_bounds = array<i64: 8, 16>}, {pipeline_mode = #tpu.pipeline_mode<synchronous>, transform_indices = @transform_1, window_bounds = array<i64: 16, 32>}, {pipeline_mode = #tpu.pipeline_mode<synchronous>, transform_indices = @transform_2, window_bounds = array<i64: 1, 32>}, {pipeline_mode = #tpu.pipeline_mode<synchronous>, transform_indices = @transform_3, window_bounds = array<i64: 32, 128>}, {pipeline_mode = #tpu.pipeline_mode<synchronous>, transform_indices = @transform_4, window_bounds = array<i64: 1, 128>}, {transform_indices = @transform_5, window_bounds = array<i64: 8, 128>}]} {
    %c0 = arith.constant 0 : index
    %c0_0 = arith.constant 0 : index
    %0 = vector.load %arg1[%c0, %c0_0] : memref<8x16xf32, #tpu.memory_space<vmem>>, vector<8x16xf32>
    %c0_1 = arith.constant 0 : index
    %c0_2 = arith.constant 0 : index
    %1 = vector.load %arg2[%c0_1, %c0_2] : memref<16x32xf32, #tpu.memory_space<vmem>>, vector<16x32xf32>
    %cst = arith.constant dense<0.000000e+00> : vector<8x32xf32>
    %2 = tpu.matmul %0, %1, %cst {dimension_numbers = #tpu.dot_dimension_numbers<[1], [0], [0], [1], [0, 0, 1, 1], [], []>} : vector<8x16xf32>, vector<16x32xf32>, vector<8x32xf32> -> vector<8x32xf32>
    %c0_3 = arith.constant 0 : index
    %c0_4 = arith.constant 0 : index
    %3 = vector.load %arg3[%c0_3, %c0_4] : memref<1x32xf32, #tpu.memory_space<vmem>>, vector<1x32xf32>
    %4 = vector.broadcast %3 : vector<1x32xf32> to vector<8x32xf32>
    %5 = arith.addf %2, %4 : vector<8x32xf32>
    %cst_5 = arith.constant 0.000000e+00 : f32
    %6 = vector.broadcast %cst_5 : f32 to vector<8x32xf32>
    %7 = arith.maximumf %5, %6 : vector<8x32xf32>
    %c0_6 = arith.constant 0 : index
    %c0_7 = arith.constant 0 : index
    %8 = vector.load %arg4[%c0_6, %c0_7] : memref<32x128xf32, #tpu.memory_space<vmem>>, vector<32x128xf32>
    %cst_8 = arith.constant dense<0.000000e+00> : vector<8x128xf32>
    %9 = tpu.matmul %7, %8, %cst_8 {dimension_numbers = #tpu.dot_dimension_numbers<[1], [0], [0], [1], [0, 0, 1, 1], [], []>} : vector<8x32xf32>, vector<32x128xf32>, vector<8x128xf32> -> vector<8x128xf32>
    %c0_9 = arith.constant 0 : index
    %c0_10 = arith.constant 0 : index
    %10 = vector.load %arg5[%c0_9, %c0_10] : memref<1x128xf32, #tpu.memory_space<vmem>>, vector<1x128xf32>
    %11 = vector.broadcast %10 : vector<1x128xf32> to vector<8x128xf32>
    %12 = arith.addf %9, %11 : vector<8x128xf32>
    %c0_11 = arith.constant 0 : index
    %c0_12 = arith.constant 0 : index
    %13 = vector.load %arg6[%c0_11, %c0_12] : memref<8x128xf32, #tpu.memory_space<vmem>>, vector<8x128xf32>
    tpu.vector_store %arg6[%c0_11, %c0_12], %12 {strides = array<i32>} : memref<8x128xf32, #tpu.memory_space<vmem>>, vector<8x128xf32>,
    return
  }
  func.func @transform_0(%arg0: i32) -> (i32, i32) {
    %c0_i32 = arith.constant 0 : i32
    %c0_i32_0 = arith.constant 0 : i32
    return %arg0, %c0_i32 : i32, i32
  }
  func.func @transform_1(%arg0: i32) -> (i32, i32) {
    %c0_i32 = arith.constant 0 : i32
    %c0_i32_0 = arith.constant 0 : i32
    %c0_i32_1 = arith.constant 0 : i32
    return %c0_i32, %c0_i32_0 : i32, i32
  }
  func.func @transform_2(%arg0: i32) -> (i32, i32) {
    %c0_i32 = arith.constant 0 : i32
    %c0_i32_0 = arith.constant 0 : i32
    %c0_i32_1 = arith.constant 0 : i32
    return %c0_i32, %c0_i32_0 : i32, i32
  }
  func.func @transform_3(%arg0: i32) -> (i32, i32) {
    %c0_i32 = arith.constant 0 : i32
    %c0_i32_0 = arith.constant 0 : i32
    %c0_i32_1 = arith.constant 0 : i32
    return %c0_i32, %c0_i32_0 : i32, i32
  }
  func.func @transform_4(%arg0: i32) -> (i32, i32) {
    %c0_i32 = arith.constant 0 : i32
    %c0_i32_0 = arith.constant 0 : i32
    %c0_i32_1 = arith.constant 0 : i32
    return %c0_i32, %c0_i32_0 : i32, i32
  }
  func.func @transform_5(%arg0: i32) -> (i32, i32) {
    %c0_i32 = arith.constant 0 : i32
    %c0_i32_0 = arith.constant 0 : i32
    return %arg0, %c0_i32 : i32, i32
  }
}

</mosaic_0001>

<bundles_post_ra>
// kernel: tpu_custom_call.1
= control target key start
LH: loop header
LB: loop body
LE: loop exit
PB: predicated region body
PF: predicated region fallthrough
CT: control target
= control target key end

     0   :  { %10 = vsyncpa [#allocation3], 0  ;;  %s488_s0 = inlined_call_operand.hbm [shape: f32[8,16], index: 0, kind: input, shape index: {}]   ;;  %s489_s1 = inlined_call_operand.hbm [shape: f32[16,32], index: 1, kind: input, shape index: {}]   ;;  %s490_s2 = inlined_call_operand.vmem [shape: f32[1,32], index: 2, kind: input, shape index: {}]   ;;  %s491_s3 = inlined_call_operand.hbm [shape: f32[32,128], index: 3, kind: input, shape index: {}]   ;;  %s492_s4 = inlined_call_operand.vmem [shape: f32[1,128], index: 4, kind: input, shape index: {}]   ;;  %s493_s5 = inlined_call_operand.hbm [shape: f32[8,128], index: 5, kind: output, shape index: {}]  }
   0x1   :  { %11 = vsyncpa [#allocation6], 0 }
   0x2   :  { %12 = vsyncpa [#allocation4], 0  ;;  %s389_s18 = smov [#allocation5]   ;;  %s295_s22 = scalar_lea.hbm %s489_s1, 256 }
   0x3   :  { %s28_s19 = sshll.u32 %s389_s18, 4  ;;  %p296_p0 = scmp.ne.s32.totalorder %s489_s1, %s295_s22  ;;  %s29_s19 = int_to_ptr.vmem [resolvable:$true] %s28_s19 }
   0x4   :  { %p299_p1 = scmp.lt.u32.totalorder %s295_s22, %s489_s1 }
   0x6   :  { %p301_p2 = pnand %p299_p1, %p296_p0 }
   0x8   :  { %304 = shalt.err (!%p301_p2)
}
   0x9   :  { %s305_s27 = scalar_lea.vmem %s29_s19, 256  ;;  %p310_p4 = scmp.lt.s32.totalorder %s29_s19, %s29_s19 }
   0xa   :  { %p306_p3 = scmp.ne.s32.totalorder %s29_s19, %s305_s27  ;;  %p311_p5 = scmp.lt.s32.totalorder %s305_s27, %s305_s27 }
   0xc   :  { %p312_p6 = por %p311_p5, %p310_p4 }
   0xe   :  { %p313_p7 = pnand %p312_p6, %p306_p3 }
  0x10   :  { %316 = shalt.err (!%p313_p7)
}
  0x11   :  { %s390_s28 = smov 128   ;;  %s391_s29 = smov 8  }
  0x12   :  { %34 = dma.hbm_to_vmem [thread:$0]  %s489_s1, 256, %s29_s19, [#allocation6], %s390_s28, %s390_s28, %s391_s29  }
  0x13   :  { %s392_s7 = smov [#allocation2]   ;;  %s393_s9 = smov [#allocation7]  }
  0x14   :  { %s19_s8 = sshll.u32 %s392_s7, 4  ;;  %s42_s10 = sshll.u32 %s393_s9, 4  ;;  %s20_s8 = int_to_ptr.vmem [resolvable:$true] %s19_s8  ;;  %s43_s10 = int_to_ptr.vmem [resolvable:$true] %s42_s10 }
  0x15   :  { %s317_s13 = scalar_lea.hbm %s488_s0, 128 }
  0x16   :  { %p318_p8 = scmp.ne.s32.totalorder %s488_s0, %s317_s13  ;;  %p321_p9 = scmp.lt.u32.totalorder %s317_s13, %s488_s0 }
  0x18   :  { %p323_p10 = pnand %p321_p9, %p318_p8 }
  0x1a   :  { %326 = shalt.err (!%p323_p10)
}
  0x1b   :  { %s327_s1 = scalar_lea.vmem %s20_s8, 128  ;;  %p332_p12 = scmp.lt.s32.totalorder %s20_s8, %s20_s8 }
  0x1c   :  { %p328_p11 = scmp.ne.s32.totalorder %s20_s8, %s327_s1  ;;  %p333_p13 = scmp.lt.s32.totalorder %s327_s1, %s327_s1 }
  0x1e   :  { %p334_p0 = por %p333_p13, %p332_p12 }
  0x20   :  { %p335_p1 = pnand %p334_p0, %p328_p11 }
  0x22   :  { %338 = shalt.err (!%p335_p1)
}
  0x23   :  { %22 = dma.hbm_to_vmem [thread:$0]  %s488_s0, 128, %s20_s8, [#allocation3]  }
  0x24   :  { %s339_s22 = scalar_lea.hbm %s491_s3, 512 }
  0x25   :  { %p340_p2 = scmp.ne.s32.totalorder %s491_s3, %s339_s22  ;;  %p343_p3 = scmp.lt.u32.totalorder %s339_s22, %s491_s3 }
  0x27   :  { %p345_p4 = pnand %p343_p3, %p340_p2 }
  0x29   :  { %348 = shalt.err (!%p345_p4)
}
  0x2a   :  { %s349_s27 = scalar_lea.vmem %s43_s10, 512  ;;  %p354_p6 = scmp.lt.s32.totalorder %s43_s10, %s43_s10 }
  0x2b   :  { %p350_p5 = scmp.ne.s32.totalorder %s43_s10, %s349_s27  ;;  %p355_p7 = scmp.lt.s32.totalorder %s349_s27, %s349_s27 }
  0x2d   :  { %p356_p8 = por %p355_p7, %p354_p6 }
  0x2f   :  { %p357_p9 = pnand %p356_p8, %p350_p5 }
  0x31   :  { %360 = shalt.err (!%p357_p9)
}
  0x32   :  { %48 = dma.hbm_to_vmem [thread:$0]  %s491_s3, 512, %s43_s10, [#allocation6], %s390_s28, %s390_s28, %s391_s29  }
  0x33   :  { %383 = dma.done.wait [#allocation3], 128  }
  0x34   :  { %384 = vsyncadd [#allocation3], 4294967168 }
  0x35   :  { %385 = dma.done.wait [#allocation6], 768  }
  0x36   :  { %386 = vsyncadd [#allocation6], 4294966528  ;;  %v394_v0 = vmov 0.0|0.0   ;;  %vm395_vm0 = vmmov 0   ;;  %v396_v1 = vmov 0.0   ;;  %v61_v2 = vld [vmem:[#allocation5] sm:$0xff] }
  0x37   :  { %277 = vmatprep.subr.bf16.mxu0 %v394_v0  ;;  %263 = vmatprep.mubr.msk.f32.mxu0 %vm395_vm0, %v396_v1  ;;  %v62_v3 = vld [vmem:[#allocation5 + $0x8] sm:$0xff]  ;;  %v145_v5 = vld [vmem:[#allocation7] sm:$0xff]  ;;  %v146_v6 = vld [vmem:[#allocation7 + $0x8] sm:$0xff]  ;;  %vm70_vm1 = vcmask 130048   ;;  %vm156_vm2 = vcmask 261120   ;;  %s397_s7 = smov [#allocation8]  }
  0x38   :  { %280 = vmatprep.subr.bf16.mxu1 %v394_v0  ;;  %274 = vmatprep.mubr.msk.f32.mxu1 %vm395_vm0, %v396_v1  ;;  %v278_v4 = vpack.c.bf16 %v62_v3, %v61_v2  ;;  %v281_v7 = vpack.c.bf16 %v146_v6, %v145_v5  ;;  %v60_v8 = vld [vmem:[#allocation2] sm:$0xff]  ;;  %v147_v9 = vld [vmem:[#allocation7 + $0x10] sm:$0xff]  ;;  %v148_v10 = vld [vmem:[#allocation7 + $0x18] sm:$0xff]  ;;  %s237_s8 = sshll.u32 %s397_s7, 4  ;;  %s238_s8 = int_to_ptr.vmem [resolvable:$true] %s237_s8 }
  0x39   :  { %v284_v11 = vpack.c.bf16 %v148_v10, %v147_v9  ;;  %v247_v12 = vld [vmem:[%s490_s2] ss:$0 sm:$0xff]  ;;  %s361_s9 = scalar_lea.vmem %s238_s8, 128  ;;  %p366_p11 = scmp.lt.s32.totalorder %s238_s8, %s238_s8 }
  0x3a   :  { %279 = vmatpush3.bf16.msra.mxu0 %v278_v4  ;;  %282 = vmatpush3.bf16.msra.mxu1 %v281_v7  ;;  %v249_v17 = vld [vmem:[%s492_s4] ss:$0 sm:$0xff]  ;;  %p362_p10 = scmp.ne.s32.totalorder %s238_s8, %s361_s9  ;;  %p367_p12 = scmp.lt.s32.totalorder %s361_s9, %s361_s9 }
  0x3b   :  { %283 = vmatprep.subr.bf16.mxu1 %v394_v0 }
  0x3c   :  { %p368_p13 = por %p367_p12, %p366_p11 }
  0x3d   :  { %264 = vmatmul.mubr.msk.f32.vlgmr.msra.gmra.mrb[0].mxu0 %vm70_vm1, %v60_v8 }
  0x3e   :  { %285 = vmatpush3.bf16.msra.mxu1 %v284_v11  ;;  %p369_p0 = pnand %p368_p13, %p362_p10 }
 0x110   :  { %v140_v13 = vpop.f32.mrb[0].mxu0 }
 0x111   :  { %v141_v14 = vadd.f32 %v247_v12, %v140_v13  ;;  %v265_v15 = vpop.f32.mrb[1].mxu0 }
 0x113   :  { %v144_v16 = vmax.f32 %v141_v14, 0.0 }
 0x115   :  { %275 = vmatmul.mubr.msk.f32.vlgmr.msra.gmra.mrb[0].mxu1 %vm156_vm2, %v144_v16 }
 0x1e8   :  { %v226_v18 = vpop.f32.mrb[0].mxu1 }
 0x1e9   :  { %v227_v19 = vadd.f32 %v249_v17, %v226_v18  ;;  %v276_v20 = vpop.f32.mrb[1].mxu1 }
 0x1eb   :  { %230 = vst [vmem:[#allocation8] sm:$0xff] %v227_v19 }
 0x1ec   :  { %372 = shalt.err (!%p369_p0)
}
 0x1ed   :  { %s373_s11 = scalar_lea.hbm %s493_s5, 128 }
 0x1ee   :  { %p374_p1 = scmp.ne.s32.totalorder %s493_s5, %s373_s11  ;;  %p377_p2 = scmp.lt.u32.totalorder %s373_s11, %s493_s5 }
 0x1f0   :  { %p379_p3 = pnand %p377_p2, %p374_p1 }
 0x1f2   :  { %382 = shalt.err (!%p379_p3)
}
 0x1f3   :  { %240 = dma.vmem_to_hbm [thread:$0]  %s238_s8, 128, %s493_s5, [#allocation4]  }
 0x1f4   :  { %387 = dma.done.wait [#allocation4], 128  }
 0x1f5   :  { %388 = vsyncadd [#allocation4], 4294967168 }
 0x1f6   :  { %244 = vsyncpa [#allocation3], 1 }
 0x1f7   :  { %245 = vsyncpa [#allocation6], 1 }
 0x1f8   :  { %246 = vsyncpa [#allocation4], 1 }

</bundles_post_ra>
